<compile_context>
chip_gen: v6e
topology: v6e:2x2x1
jax: 0.10.0
libtpu: 0.0.40
codegen_flags: <defaults>
</compile_context>

<pallas_src>
import jax
import jax.numpy as jnp
from jax import lax
from jax.experimental import pallas as pl
from jax.experimental.pallas import tpu as pltpu


def _round_up(x: int, m: int) -> int:
    return ((x + m - 1) // m) * m


def _bae_tile_kernel(x_ref, wenc_ref, wdec_ref, bdec_ref, out_ref):
    """Per-row-tile encoder -> heaviside -> decoder."""
    x = x_ref[...]                     # [TN, E]
    # encoder (bias=False): x @ W_enc^T  -> [TN, H]; contract E (last dim of both)
    enc = lax.dot_general(
        x, wenc_ref[...],
        dimension_numbers=(((1,), (1,)), ((), ())),
        preferred_element_type=jnp.float32)
    # heaviside as defined by the module: (z >= 0) -> 1.0 else 0.0
    binary = (enc >= 0).astype(jnp.float32)
    # decoder: binary @ W_dec^T + b  -> [TN, E]; contract H (last dim of both)
    out = lax.dot_general(
        binary, wdec_ref[...],
        dimension_numbers=(((1,), (1,)), ((), ())),
        preferred_element_type=jnp.float32)
    out_ref[...] = (out + bdec_ref[...]).astype(out_ref.dtype)


def _reg_loss_kernel(wenc_ref, wdec_ref, loss_ref):
    """One-shot: || W_dec @ W_enc - I ||_F (batch-independent)."""
    corr = lax.dot_general(
        wdec_ref[...], wenc_ref[...],
        dimension_numbers=(((1,), (0,)), ((), ())),
        preferred_element_type=jnp.float32)          # [E, E]
    e = corr.shape[0]
    row = lax.broadcasted_iota(jnp.int32, (e, e), 0)
    col = lax.broadcasted_iota(jnp.int32, (e, e), 1)
    diff = corr - (row == col).astype(jnp.float32)
    loss_ref[...] = jnp.sqrt(jnp.sum(diff * diff, keepdims=True))   # [1, 1]


def binarizing_autoencoder_forward(tokens, embed_table, w_enc, w_dec, b_dec):
    """Returns (in_embed, out_embed, reg_loss) matching the PyTorch module."""
    # Embedding lookup (frozen nn.Embedding) -- glue gather kept in plain JAX.
    in_embed = jnp.take(embed_table, tokens, axis=0)          # [B, T, E]
    B, T, E = in_embed.shape
    H = w_enc.shape[0]
    N = B * T

    x2d = in_embed.reshape(N, E).astype(jnp.float32)
    w_enc_f = w_enc.astype(jnp.float32)
    w_dec_f = w_dec.astype(jnp.float32)
    b2d = b_dec.reshape(1, E).astype(jnp.float32)

    # Row tile: largest sensible tile, 8-aligned; pad N so the grid is exact.
    TN = min(512, _round_up(N, 8))
    N_pad = _round_up(N, TN)
    if N_pad != N:
        x2d = jnp.pad(x2d, ((0, N_pad - N), (0, 0)))
    grid = (N_pad // TN,)

    out2d = pl.pallas_call(
        _bae_tile_kernel,
        out_shape=jax.ShapeDtypeStruct((N_pad, E), jnp.float32),
        grid_spec=pltpu.PrefetchScalarGridSpec(
            num_scalar_prefetch=0,
            grid=grid,
            in_specs=[
                pl.BlockSpec((TN, E), lambda i: (i, 0)),   # streamed rows
                pl.BlockSpec((H, E), lambda i: (0, 0)),    # resident weights
                pl.BlockSpec((E, H), lambda i: (0, 0)),
                pl.BlockSpec((1, E), lambda i: (0, 0)),    # resident bias
            ],
            out_specs=pl.BlockSpec((TN, E), lambda i: (i, 0)),
        ),
        compiler_params=pltpu.CompilerParams(
            dimension_semantics=("parallel",),            # 2-TC sharding on v7x
            vmem_limit_bytes=32 * 1024 * 1024,
        ),
    )(x2d, w_enc_f, w_dec_f, b2d)

    # Batch-independent regularizer in its own tiny one-shot call.
    loss = pl.pallas_call(
        _reg_loss_kernel,
        out_shape=jax.ShapeDtypeStruct((1, 1), jnp.float32),
        in_specs=[pl.BlockSpec(memory_space=pltpu.MemorySpace.VMEM)] * 2,
        out_specs=pl.BlockSpec(memory_space=pltpu.MemorySpace.VMEM),
    )(w_enc_f, w_dec_f)

    out_embed = out2d[:N].reshape(B, T, E)
    reg_loss = loss[0, 0]
    # TODO(synk): forward-only; no straight-through estimator for the heaviside,
    # so autodiff through this kernel gives zero encoder gradients (as in torch).
    return in_embed, out_embed, reg_loss


if __name__ == "__main__":
    # Small shapes consistent with the module's constructor.
    vocab_size, embed_dim, hidden_dim = 64, 32, 16   # 2**16 > 64 (assert in __init__)
    B, T = 2, 8

    key = jax.random.PRNGKey(0)
    k_emb, k_enc, k_dec, k_tok = jax.random.split(key, 4)

    # Parameter init mirroring init_params():
    #   embedding: provided externally (standard normal here), frozen
    #   encoder.weight ~ U(-0.1, 0.1)     [hidden_dim, embed_dim]
    #   decoder.weight ~ U(-0.1, 0.1)     [embed_dim, hidden_dim]
    #   decoder.bias   = 0                [embed_dim]
    # (weight tying disabled; it would require embed_dim == hidden_dim)
    embed_table = jax.random.normal(k_emb, (vocab_size, embed_dim), jnp.float32)
    w_enc = jax.random.uniform(k_enc, (hidden_dim, embed_dim), jnp.float32, -0.1, 0.1)
    w_dec = jax.random.uniform(k_dec, (embed_dim, hidden_dim), jnp.float32, -0.1, 0.1)
    b_dec = jnp.zeros((embed_dim,), jnp.float32)

    tokens = jax.random.randint(k_tok, (B, T), 0, vocab_size, dtype=jnp.int32)

    fwd = jax.jit(binarizing_autoencoder_forward)
    in_embed, out_embed, reg_loss = fwd(tokens, embed_table, w_enc, w_dec, b_dec)
    jax.block_until_ready((in_embed, out_embed, reg_loss))

    # Pure-JAX reference check.
    ref_in = jnp.take(embed_table, tokens, axis=0)
    ref_bin = (ref_in.reshape(-1, embed_dim) @ w_enc.T >= 0).astype(jnp.float32)
    ref_out = (ref_bin @ w_dec.T + b_dec).reshape(B, T, embed_dim)
    ref_corr = w_dec @ w_enc
    ref_loss = jnp.sqrt(jnp.sum((ref_corr - jnp.eye(embed_dim)) ** 2))

    assert in_embed.shape == (B, T, embed_dim)
    assert out_embed.shape == (B, T, embed_dim)
    assert reg_loss.shape == ()
    assert jnp.allclose(out_embed, ref_out, atol=1e-5, rtol=1e-5)
    assert jnp.allclose(reg_loss, ref_loss, atol=1e-5, rtol=1e-5)
    print("KERNEL_OK")
</pallas_src>

<mosaic_0001>
module attributes {stable_mosaic.version = 11 : i64} {
  func.func @_reg_loss_kernel(%arg0: memref<16x32xf32, #tpu.memory_space<vmem>>, %arg1: memref<32x16xf32, #tpu.memory_space<vmem>>, %arg2: memref<1x1xf32, #tpu.memory_space<vmem>>) attributes {dimension_semantics = [], scalar_prefetch = 0 : i64, scratch_operands = 0 : i64, tpu.core_type = #tpu.core_type<tc>} {
    %c0 = arith.constant 0 : index
    %c0_0 = arith.constant 0 : index
    %0 = vector.load %arg1[%c0, %c0_0] : memref<32x16xf32, #tpu.memory_space<vmem>>, vector<32x16xf32>
    %c0_1 = arith.constant 0 : index
    %c0_2 = arith.constant 0 : index
    %1 = vector.load %arg0[%c0_1, %c0_2] : memref<16x32xf32, #tpu.memory_space<vmem>>, vector<16x32xf32>
    %cst = arith.constant dense<0.000000e+00> : vector<32x32xf32>
    %2 = tpu.matmul %0, %1, %cst {dimension_numbers = #tpu.dot_dimension_numbers<[1], [0], [0], [1], [0, 0, 1, 1], [], []>} : vector<32x16xf32>, vector<16x32xf32>, vector<32x32xf32> -> vector<32x32xf32>
    %3 = tpu.iota {dimensions = array<i32: 0>} : vector<32x32xi32>
    %4 = tpu.iota {dimensions = array<i32: 1>} : vector<32x32xi32>
    %5 = arith.cmpi eq, %3, %4 : vector<32x32xi32>
    %6 = arith.extui %5 : vector<32x32xi1> to vector<32x32xi32>
    %7 = arith.sitofp %6 : vector<32x32xi32> to vector<32x32xf32>
    %8 = arith.subf %2, %7 : vector<32x32xf32>
    %9 = arith.mulf %8, %8 : vector<32x32xf32>
    %10 = vector.shape_cast %9 : vector<32x32xf32> to vector<1x32x32xf32>
    %cst_3 = arith.constant dense<0.000000e+00> : vector<1xf32>
    %11 = vector.multi_reduction <add>, %10, %cst_3 [1, 2] : vector<1x32x32xf32> to vector<1xf32>
    %12 = vector.shape_cast %11 : vector<1xf32> to vector<1x1x1xf32>
    %13 = vector.extract %12[0, 0, 0] : f32 from vector<1x1x1xf32>
    %14 = vector.broadcast %13 : f32 to vector<1x1xf32>
    %15 = math.sqrt %14 : vector<1x1xf32>
    %c0_4 = arith.constant 0 : index
    %c0_5 = arith.constant 0 : index
    %16 = vector.load %arg2[%c0_4, %c0_5] : memref<1x1xf32, #tpu.memory_space<vmem>>, vector<1x1xf32>
    tpu.vector_store %arg2[%c0_4, %c0_5], %15 {strides = array<i32>} : memref<1x1xf32, #tpu.memory_space<vmem>>, vector<1x1xf32>,
    return
  }
}

module attributes {stable_mosaic.version = 11 : i64} {
  func.func @_bae_tile_kernel(%arg0: i32, %arg1: memref<16x32xf32, #tpu.memory_space<vmem>>, %arg2: memref<16x32xf32, #tpu.memory_space<vmem>>, %arg3: memref<32x16xf32, #tpu.memory_space<vmem>>, %arg4: memref<1x32xf32, #tpu.memory_space<vmem>>, %arg5: memref<16x32xf32, #tpu.memory_space<vmem>>) attributes {dimension_semantics = [#tpu.dimension_semantics<parallel>], iteration_bounds = array<i64: 1>, scalar_prefetch = 0 : i64, scratch_operands = 0 : i64, tpu.core_type = #tpu.core_type<tc>, window_params = [{transform_indices = @transform_0, window_bounds = array<i64: 16, 32>}, {pipeline_mode = #tpu.pipeline_mode<synchronous>, transform_indices = @transform_1, window_bounds = array<i64: 16, 32>}, {pipeline_mode = #tpu.pipeline_mode<synchronous>, transform_indices = @transform_2, window_bounds = array<i64: 32, 16>}, {pipeline_mode = #tpu.pipeline_mode<synchronous>, transform_indices = @transform_3, window_bounds = array<i64: 1, 32>}, {transform_indices = @transform_4, window_bounds = array<i64: 16, 32>}]} {
    %c0 = arith.constant 0 : index
    %c0_0 = arith.constant 0 : index
    %0 = vector.load %arg1[%c0, %c0_0] : memref<16x32xf32, #tpu.memory_space<vmem>>, vector<16x32xf32>
    %c0_1 = arith.constant 0 : index
    %c0_2 = arith.constant 0 : index
    %1 = vector.load %arg2[%c0_1, %c0_2] : memref<16x32xf32, #tpu.memory_space<vmem>>, vector<16x32xf32>
    %cst = arith.constant dense<0.000000e+00> : vector<16x16xf32>
    %2 = tpu.matmul %0, %1, %cst {dimension_numbers = #tpu.dot_dimension_numbers<[1], [1], [0], [0], [0, 0, 1, 0], [], []>} : vector<16x32xf32>, vector<16x32xf32>, vector<16x16xf32> -> vector<16x16xf32>
    %cst_3 = arith.constant 0.000000e+00 : f32
    %3 = vector.broadcast %cst_3 : f32 to vector<16x16xf32>
    %4 = arith.cmpf oge, %2, %3 : vector<16x16xf32>
    %5 = arith.extui %4 : vector<16x16xi1> to vector<16x16xi32>
    %6 = arith.sitofp %5 : vector<16x16xi32> to vector<16x16xf32>
    %c0_4 = arith.constant 0 : index
    %c0_5 = arith.constant 0 : index
    %7 = vector.load %arg3[%c0_4, %c0_5] : memref<32x16xf32, #tpu.memory_space<vmem>>, vector<32x16xf32>
    %cst_6 = arith.constant dense<0.000000e+00> : vector<16x32xf32>
    %8 = tpu.matmul %6, %7, %cst_6 {dimension_numbers = #tpu.dot_dimension_numbers<[1], [1], [0], [0], [0, 0, 1, 0], [], []>} : vector<16x16xf32>, vector<32x16xf32>, vector<16x32xf32> -> vector<16x32xf32>
    %c0_7 = arith.constant 0 : index
    %c0_8 = arith.constant 0 : index
    %9 = vector.load %arg4[%c0_7, %c0_8] : memref<1x32xf32, #tpu.memory_space<vmem>>, vector<1x32xf32>
    %10 = vector.broadcast %9 : vector<1x32xf32> to vector<16x32xf32>
    %11 = arith.addf %8, %10 : vector<16x32xf32>
    %c0_9 = arith.constant 0 : index
    %c0_10 = arith.constant 0 : index
    %12 = vector.load %arg5[%c0_9, %c0_10] : memref<16x32xf32, #tpu.memory_space<vmem>>, vector<16x32xf32>
    tpu.vector_store %arg5[%c0_9, %c0_10], %11 {strides = array<i32>} : memref<16x32xf32, #tpu.memory_space<vmem>>, vector<16x32xf32>,
    return
  }
  func.func @transform_0(%arg0: i32) -> (i32, i32) {
    %c0_i32 = arith.constant 0 : i32
    %c0_i32_0 = arith.constant 0 : i32
    return %arg0, %c0_i32 : i32, i32
  }
  func.func @transform_1(%arg0: i32) -> (i32, i32) {
    %c0_i32 = arith.constant 0 : i32
    %c0_i32_0 = arith.constant 0 : i32
    %c0_i32_1 = arith.constant 0 : i32
    return %c0_i32, %c0_i32_0 : i32, i32
  }
  func.func @transform_2(%arg0: i32) -> (i32, i32) {
    %c0_i32 = arith.constant 0 : i32
    %c0_i32_0 = arith.constant 0 : i32
    %c0_i32_1 = arith.constant 0 : i32
    return %c0_i32, %c0_i32_0 : i32, i32
  }
  func.func @transform_3(%arg0: i32) -> (i32, i32) {
    %c0_i32 = arith.constant 0 : i32
    %c0_i32_0 = arith.constant 0 : i32
    %c0_i32_1 = arith.constant 0 : i32
    return %c0_i32, %c0_i32_0 : i32, i32
  }
  func.func @transform_4(%arg0: i32) -> (i32, i32) {
    %c0_i32 = arith.constant 0 : i32
    %c0_i32_0 = arith.constant 0 : i32
    return %arg0, %c0_i32 : i32, i32
  }
}

</mosaic_0001>

<bundles_post_ra>
// kernel: binarizing_autoencoder_forward.3
= control target key start
LH: loop header
LB: loop body
LE: loop exit
PB: predicated region body
PF: predicated region fallthrough
CT: control target
= control target key end

     0   :  { %vm18_vm0 = vcmask 130048   ;;  %s278_s0 = inlined_call_operand.vmem [shape: f32[16,32], index: 0, kind: input, shape index: {}]   ;;  %s279_s1 = inlined_call_operand.vmem [shape: f32[32,16], index: 1, kind: input, shape index: {}]   ;;  %s280_s2 = inlined_call_operand.hbm [shape: f32[1,1], index: 2, kind: output, shape index: {}]  }
   0x1   :  { %v17_v0 = vld [vmem:[%s278_s0 + $0x8] sm:$0xff]  ;;  %v16_v1 = vld [vmem:[%s278_s0] sm:$0xff]  ;;  %v14_v3 = vld [vmem:[%s279_s1 + $0x10] sm:$0xff] }
   0x2   :  { %198 = vmatprep.subr.mxu0 %v17_v0  ;;  %208 = vmatprep.subr.mxu1 %v17_v0  ;;  %v12_v2 = vld [vmem:[%s279_s1] sm:$0xff] }
   0x3   :  { %199 = vmatpush3.msra.mxu0 %v17_v0  ;;  %210 = vmatpush3.msra.mxu1 %v17_v0 }
   0x4   :  { %7 = vsyncpa [#allocation3], 0  ;;  %200 = vmatprep.subr.mxu0 %v16_v1  ;;  %209 = vmatprep.subr.mxu1 %v16_v1  ;;  %v13_v4 = vld [vmem:[%s279_s1 + $0x8] sm:$0xff]  ;;  %v15_v5 = vld [vmem:[%s279_s1 + $0x18] sm:$0xff]  ;;  %v116_v6 = vlaneseq  ;;  %v240_v12 = vmov 0.0   ;;  %vm143_vm5 = vcmask 261120  }
   0x5   :  { %201 = vmatpush3.msra.mxu0 %v16_v1  ;;  %211 = vmatpush3.msra.mxu1 %v16_v1  ;;  %s241_s20 = smov [#allocation2]   ;;  %vm168_vm7 = vcmask 0  }
   0x6   :  { %202 = vmatprep.mubr.msk.f32.mxu0 %vm18_vm0, %v12_v2  ;;  %205 = vmatprep.mubr.msk.f32.mxu1 %vm18_vm0, %v14_v3  ;;  %v117_v7 = vshrl.u32 %v116_v6, 7  ;;  %v122_v9 = vand.u32 127, %v116_v6  ;;  %s176_s21 = sshll.u32 %s241_s20, 4  ;;  %s177_s21 = int_to_ptr.vmem [resolvable:$true] %s176_s21 }
   0x7   :  { %203 = vmatmul.mubr.msk.f32.vlgmr.msra.gmra.mxu0 %vm18_vm0, %v13_v4  ;;  %206 = vmatmul.mubr.msk.f32.vlgmr.msra.gmra.mxu1 %vm18_vm0, %v15_v5  ;;  %s218_s22 = scalar_lea.vmem %s177_s21, 16  ;;  %s222_s23 = scalar_lea.vmem %s177_s21, 32 }
   0x8   :  { %v118_v8 = vadd.s32 8, %v117_v7  ;;  %v120_v10 = vadd.s32 24, %v117_v7  ;;  %v119_v11 = vadd.s32 16, %v117_v7  ;;  %vm123_vm3 = vcmp.eq.s32.totalorder %v117_v7, %v122_v9  ;;  %p219_p0 = scmp.ne.s32.totalorder %s177_s21, %s218_s22  ;;  %p223_p1 = scmp.lt.s32.totalorder %s177_s21, %s177_s21 }
   0x9   :  { %v188_v17 = vsel %vm123_vm3, 1.0, %v240_v12  ;;  %p224_p2 = scmp.lt.s32.totalorder %s222_s23, %s218_s22 }
   0xa   :  { %vm124_vm1 = vcmp.eq.s32.totalorder %v118_v8, %v122_v9  ;;  %vm126_vm2 = vcmp.eq.s32.totalorder %v120_v10, %v122_v9  ;;  %vm125_vm4 = vcmp.eq.s32.totalorder %v119_v11, %v122_v9 }
   0xb   :  { %v189_v13 = vsel %vm124_vm1, 1.0, %v240_v12  ;;  %v191_v16 = vsel %vm126_vm2, 1.0, %v240_v12  ;;  %v190_v18 = vsel %vm125_vm4, 1.0, %v240_v12  ;;  %p225_p3 = por %p224_p2, %p223_p1 }
   0xd   :  { %p226_p4 = pnand %p225_p3, %p219_p0 }
  0xc7   :  { %v204_v14 = vpop.f32.mrf.mxu0  ;;  %v207_v15 = vpop.f32.mrf.mxu1 }
  0xc8   :  { %v136_v19 = vsub.f32 %v204_v14, %v189_v13  ;;  %v138_v23 = vsub.f32 %v207_v15, %v191_v16 }
  0xc9   :  { %v97_v20 = vpop.f32.mrf.mxu0  ;;  %v107_v21 = vpop.f32.mrf.mxu1 }
  0xca   :  { %v140_v22 = vmul.f32 %v136_v19, %v136_v19  ;;  %v135_v24 = vsub.f32 %v97_v20, %v188_v17  ;;  %v137_v25 = vsub.f32 %v107_v21, %v190_v18  ;;  %v142_v29 = vmul.f32 %v138_v23, %v138_v23 }
  0xcc   :  { %v139_v26 = vmul.f32 %v135_v24, %v135_v24  ;;  %v141_v27 = vmul.f32 %v137_v25, %v137_v25  ;;  %v145_v28 = vsel %vm143_vm5, %v140_v22, 0.0  ;;  %v149_v34 = vsel %vm143_vm5, %v142_v29, 0.0 }
  0xce   :  { %v144_v30 = vsel %vm143_vm5, %v139_v26, 0.0  ;;  %v147_v32 = vsel %vm143_vm5, %v141_v27, 0.0 }
  0xcf   :  { %v146_v31 = vadd.f32 %v145_v28, %v144_v30 }
  0xd1   :  { %v148_v33 = vadd.f32 %v147_v32, %v146_v31 }
  0xd3   :  { %v150_v35 = vadd.f32 %v149_v34, %v148_v33 }
  0xd5   :  { %151 = vadd.xlane.f32.xlu0 %v150_v35 }
 0x15e   :  { %v152_v36 = vpop.xlane.xlu0 %151 }
 0x15f   :  { %v153_v37 = vrot.slane %v152_v36, 4 }
 0x161   :  { %v154_v38 = vadd.f32 %v153_v37, %v152_v36 }
 0x163   :  { %v155_v39 = vrot.slane %v154_v38, 2 }
 0x165   :  { %v156_v40 = vadd.f32 %v155_v39, %v154_v38 }
 0x167   :  { %v157_v41 = vrot.slane %v156_v40, 1 }
 0x169   :  { %v158_v42 = vadd.f32 %v157_v41, %v156_v40 }
 0x16b   :  { %212 = vpush %v158_v42 }
 0x19c   :  { %s213_s1 = spop %212 }
 0x19d   :  { %v160_v43 = vstv %s213_s1 }
 0x19e   :  { %216 = vrsqrt.f32 %v160_v43  ;;  %vm163_vm6 = vcmp.eq.f32.partialorder %v160_v43, inf  ;;  %v166_v46 = vand.u32 2147483648, %v160_v43  ;;  %vm165_vm8 = vcmp.eq.f32.partialorder %v160_v43, 0.0 }
 0x1ab   :  { %v217_v44 = vpop.eup %216 }
 0x1ac   :  { %v162_v45 = vmul.f32 %v217_v44, %v160_v43 }
 0x1ae   :  { %v164_v47 = vsel %vm163_vm6, %v160_v43, %v162_v45 }
 0x1af   :  { %v167_v48 = vsel %vm165_vm8, %v166_v46, %v164_v47 }
 0x1b0   :  { %169 = vst.msk [vmem:[#allocation2] sm:$0x1] %vm168_vm7, %v167_v48 }
 0x1b1   :  { %229 = shalt.err (!%p226_p4)
}
 0x1b2   :  { %179 = dma.vmem_to_hbm [thread:$0]  %s177_s21, 16, %s280_s2, [#allocation3]  }
 0x1b3   :  { %238 = dma.done.wait [#allocation3], 16  }
 0x1b4   :  { %239 = vsyncadd [#allocation3], 4294967280 }
 0x1b5   :  { %183 = vsyncpa [#allocation3], 1 }

// kernel: binarizing_autoencoder_forward.2
= control target key start
LH: loop header
LB: loop body
LE: loop exit
PB: predicated region body
PF: predicated region fallthrough
CT: control target
= control target key end

     0   :  { %vm22_vm0 = vcmask 261120   ;;  %vm127_vm1 = vcmask 130048   ;;  %s383_s0 = inlined_call_operand.vmem [shape: f32[16,32], index: 0, kind: input, shape index: {}]   ;;  %s384_s1 = inlined_call_operand.vmem [shape: f32[16,32], index: 1, kind: input, shape index: {}]   ;;  %s385_s2 = inlined_call_operand.vmem [shape: f32[32,16], index: 2, kind: input, shape index: {}]   ;;  %s386_s3 = inlined_call_operand.vmem [shape: f32[1,32], index: 3, kind: input, shape index: {}]   ;;  %s387_s4 = inlined_call_operand.hbm [shape: f32[16,32], index: 4, kind: output, shape index: {}]  }
   0x1   :  { %v21_v0 = vld [vmem:[%s384_s1 + $0x8] sm:$0xff]  ;;  %v20_v1 = vld [vmem:[%s384_s1] sm:$0xff]  ;;  %v119_v3 = vld [vmem:[%s385_s2 + $0x18] sm:$0xff] }
   0x2   :  { %v18_v2 = vld [vmem:[%s383_s0] sm:$0xff]  ;;  %262 = vmatprep.subr.msk.mxu0 %vm22_vm0, %v21_v0  ;;  %v118_v4 = vld [vmem:[%s385_s2 + $0x10] sm:$0xff]  ;;  %269 = vmatprep.subr.msk.mxu1 %vm127_vm1, %v119_v3 }
   0x3   :  { %266 = vmatprep.mubr.msk.f32.mxu0 %vm22_vm0, %v18_v2  ;;  %263 = vmatpush3.xpose.msk.msra.mxu0 %vm22_vm0, %v21_v0 }
   0x4   :  { %9 = vsyncpa [#allocation3], 0  ;;  %264 = vmatprep.subr.msk.mxu0 %vm22_vm0, %v20_v1  ;;  %270 = vmatpush3.xpose.msk.msra.mxu1 %vm127_vm1, %v119_v3  ;;  %v117_v5 = vld [vmem:[%s385_s2 + $0x8] sm:$0xff]  ;;  %v116_v7 = vld [vmem:[%s385_s2] sm:$0xff]  ;;  %v306_v10 = vmov 0.0   ;;  %s307_s2 = smov [#allocation2]  }
   0x5   :  { %271 = vmatprep.subr.msk.mxu1 %vm127_vm1, %v118_v4  ;;  %v19_v6 = vld [vmem:[%s383_s0 + $0x8] sm:$0xff]  ;;  %v245_v13 = vld [vmem:[%s386_s3] ss:$0 sm:$0xff]  ;;  %s228_s5 = sshll.u32 %s307_s2, 4  ;;  %s229_s5 = int_to_ptr.vmem [resolvable:$true] %s228_s5 }
   0x6   :  { %s284_s6 = scalar_lea.vmem %s229_s5, 256  ;;  %p289_p1 = scmp.lt.s32.totalorder %s229_s5, %s229_s5 }
   0x7   :  { %265 = vmatpush3.xpose.msk.msra.mxu0 %vm22_vm0, %v20_v1  ;;  %p285_p0 = scmp.ne.s32.totalorder %s229_s5, %s284_s6  ;;  %p290_p2 = scmp.lt.s32.totalorder %s284_s6, %s284_s6 }
   0x8   :  { %272 = vmatpush3.xpose.msk.msra.mxu1 %vm127_vm1, %v118_v4 }
   0x9   :  { %273 = vmatprep.subr.msk.mxu1 %vm127_vm1, %v117_v5  ;;  %p291_p3 = por %p290_p2, %p289_p1 }
   0xa   :  { %267 = vmatmul.mubr.msk.f32.vlgmr.msra.gmra.mxu0 %vm22_vm0, %v19_v6 }
   0xb   :  { %p292_p4 = pnand %p291_p3, %p285_p0 }
   0xc   :  { %274 = vmatpush3.xpose.msk.msra.mxu1 %vm127_vm1, %v117_v5 }
   0xd   :  { %275 = vmatprep.subr.msk.mxu1 %vm127_vm1, %v116_v7 }
  0x10   :  { %276 = vmatpush3.xpose.msk.msra.mxu1 %vm127_vm1, %v116_v7 }
  0xca   :  { %v268_v8 = vpop.f32.mrf.mxu0 }
  0xcb   :  { %vm111_vm2 = vcmp.ge.f32.partialorder %v268_v8, 0.0 }
  0xcc   :  { %v101_v9 = vpop.f32.mrf.mxu0  ;;  %v244_v12 = vsel %vm111_vm2, 1.0, %v306_v10 }
  0xcd   :  { %vm110_vm3 = vcmp.ge.f32.partialorder %v101_v9, 0.0 }
  0xce   :  { %v243_v11 = vsel %vm110_vm3, 1.0, %v306_v10 }
  0xcf   :  { %277 = vmatprep.mubr.msk.f32.mxu1 %vm127_vm1, %v243_v11 }
  0xd0   :  { %278 = vmatmul.mubr.msk.f32.vlgmr.msra.gmra.mxu1 %vm127_vm1, %v244_v12 }
 0x190   :  { %v279_v14 = vpop.f32.mrf.mxu1 }
 0x191   :  { %v218_v15 = vadd.f32 %v279_v14, %v245_v13 }
 0x192   :  { %v212_v16 = vpop.f32.mrf.mxu1 }
 0x193   :  { %222 = vst.msk [vmem:[#allocation2 + $0x8] sm:$0xff] %vm22_vm0, %v218_v15  ;;  %v213_v17 = vadd.f32 %v245_v13, %v212_v16 }
 0x195   :  { %221 = vst.msk [vmem:[#allocation2] sm:$0xff] %vm22_vm0, %v213_v17 }
 0x196   :  { %295 = shalt.err (!%p292_p4)
}
 0x197   :  { %s308_s7 = smov 128   ;;  %s309_s3 = smov 8  }
 0x198   :  { %234 = dma.vmem_to_hbm [thread:$0]  %s229_s5, 256, %s387_s4, [#allocation3], %s308_s7, %s308_s7, %s309_s3  }
 0x199   :  { %304 = dma.done.wait [#allocation3], 256  }
 0x19a   :  { %305 = vsyncadd [#allocation3], 4294967040 }
 0x19b   :  { %238 = vsyncpa [#allocation3], 1 }

</bundles_post_ra>
